<compile_context>
chip_gen: v7x
topology: tpu7x:2x2x1
jax: 0.10.0
libtpu: 0.0.40
codegen_flags: <defaults>
</compile_context>

<pallas_src>
import math

import jax
import jax.numpy as jnp
from jax import lax
from jax.experimental import pallas as pl
from jax.experimental.pallas import tpu as pltpu


def _round_up(x: int, m: int) -> int:
    return ((x + m - 1) // m) * m


def _linear_kernel(x_ref, w_ref, o_ref, acc_ref):
    """Compute one (tm, tn) output tile; K is streamed over the last grid axis.

    x_ref:   (tm, tk)  activation tile
    w_ref:   (tn, tk)  weight tile in native (out, in) layout
    o_ref:   (tm, tn)  output tile (resident across the K axis)
    acc_ref: (tm, tn)  f32 accumulator scratch
    """
    k = pl.program_id(2)

    @pl.when(k == 0)
    def _():
        acc_ref[...] = jnp.zeros_like(acc_ref)

    # (tm, tk) x (tn, tk) -> (tm, tn): contract x dim 1 with w dim 1
    # (i.e. x @ w.T) — lowers to an MXU matmul with transposed RHS.
    acc_ref[...] += lax.dot_general(
        x_ref[...],
        w_ref[...],
        dimension_numbers=(((1,), (1,)), ((), ())),
        preferred_element_type=jnp.float32,
    )

    @pl.when(k == pl.num_programs(2) - 1)
    def _():
        o_ref[...] = acc_ref[...].astype(o_ref.dtype)


def linear_forward(
    x: jax.Array,
    weight: jax.Array,
    *,
    tm: int = 512,
    tn: int = 512,
    tk: int = 1024,
) -> jax.Array:
    """y = x @ weight.T, weight shape (out_features, in_features)."""
    out_features, in_features = weight.shape
    assert x.shape[-1] == in_features, (x.shape, weight.shape)

    lead_shape = x.shape[:-1]
    M = int(math.prod(lead_shape)) if lead_shape else 1
    N, K = out_features, in_features
    x2d = x.reshape(M, K)

    # Clamp tiles to the (padded) problem so tiny shapes don't waste VMEM,
    # while keeping minor-dim tiles lane-dense (multiples of 128) and the
    # second-to-last a multiple of 8 — satisfies the (8,128) layout rule.
    tm_t = min(tm, _round_up(M, 8))
    tn_t = min(tn, _round_up(N, 128))
    tk_t = min(tk, _round_up(K, 128))

    Mp = _round_up(M, tm_t)
    Np = _round_up(N, tn_t)
    Kp = _round_up(K, tk_t)

    # Zero-pad up to the tile grid (padded K contributes zeros to the sum;
    # padded M/N rows/cols are sliced off afterwards).
    # TODO(synk): in a real model, store the weight pre-padded so no per-call
    # jnp.pad of the weight is needed.
    if (Mp, Kp) != (M, K):
        x2d = jnp.pad(x2d, ((0, Mp - M), (0, Kp - K)))
    if (Np, Kp) != (N, K):
        w = jnp.pad(weight, ((0, Np - N), (0, Kp - K)))
    else:
        w = weight

    grid = (Mp // tm_t, Np // tn_t, Kp // tk_t)

    itemsize_x = jnp.dtype(x.dtype).itemsize
    itemsize_w = jnp.dtype(weight.dtype).itemsize
    cost = pl.CostEstimate(
        flops=2 * M * N * K,
        transcendentals=0,
        bytes_accessed=M * K * itemsize_x + N * K * itemsize_w + M * N * itemsize_x,
    )

    out2d = pl.pallas_call(
        _linear_kernel,
        out_shape=jax.ShapeDtypeStruct((Mp, Np), x.dtype),
        grid_spec=pltpu.PrefetchScalarGridSpec(
            num_scalar_prefetch=0,
            grid=grid,
            in_specs=[
                # x: (tm, tk) tile at block (i, k)
                pl.BlockSpec((tm_t, tk_t), lambda i, j, k: (i, k)),
                # weight in native (out, in) layout: (tn, tk) tile at block (j, k)
                pl.BlockSpec((tn_t, tk_t), lambda i, j, k: (j, k)),
            ],
            # Output tile fixed along K -> resident accumulator target.
            out_specs=pl.BlockSpec((tm_t, tn_t), lambda i, j, k: (i, j)),
            scratch_shapes=[pltpu.VMEM((tm_t, tn_t), jnp.float32)],
        ),
        compiler_params=pltpu.CompilerParams(
            dimension_semantics=("parallel", "parallel", "arbitrary"),
            vmem_limit_bytes=32 * 1024 * 1024,
        ),
        cost_estimate=cost,
    )(x2d, w)

    out2d = out2d[:M, :N]
    return out2d.reshape(*lead_shape, N)


def init_linear_weight(key, in_features: int, out_features: int, dtype=jnp.float32):
    # Matches nn.init.trunc_normal_(mean=0, std=std, a=-3*std, b=3*std)
    std = (2.0 / (in_features + out_features)) ** 0.5
    w = (
        jax.random.truncated_normal(
            key,
            lower=-3.0,
            upper=3.0,
            shape=(out_features, in_features),
            dtype=jnp.float32,
        )
        * std
    )
    return w.astype(dtype)


if __name__ == "__main__":
    key = jax.random.PRNGKey(0)
    k_w, k_x = jax.random.split(key)

    # Small shapes matching the module's forward: x (batch, seq, in) @ W.T
    batch, seq, in_features, out_features = 2, 8, 32, 64

    weight = init_linear_weight(k_w, in_features, out_features)
    x = jax.random.normal(k_x, (batch, seq, in_features), dtype=jnp.float32)

    y = linear_forward(x, weight)
    y = jax.block_until_ready(y)

    # sanity check against plain-JAX reference
    y_ref = x @ weight.T
    assert y.shape == (batch, seq, out_features)
    assert jnp.allclose(y, y_ref, atol=1e-5, rtol=1e-5)

    # Also exercise a multi-step K reduction (K > tk when clamped) and the
    # padding path, with bf16 inputs.
    k_w2, k_x2 = jax.random.split(k_w)
    in2, out2 = 1024 + 64, 384  # non-multiples of 128 -> padding path
    w2 = init_linear_weight(k_w2, in2, out2, dtype=jnp.bfloat16)
    x2 = jax.random.normal(k_x2, (4, 96, in2), dtype=jnp.bfloat16)
    y2 = jax.block_until_ready(linear_forward(x2, w2, tk=512))
    y2_ref = (x2.astype(jnp.float32) @ w2.astype(jnp.float32).T).astype(jnp.bfloat16)
    assert y2.shape == (4, 96, out2)
    assert jnp.allclose(
        y2.astype(jnp.float32), y2_ref.astype(jnp.float32), atol=2e-2, rtol=2e-2
    )

    print("KERNEL_OK")
</pallas_src>

<mosaic_0001>
module attributes {stable_mosaic.version = 11 : i64} {
  func.func @_linear_kernel(%arg0: i32, %arg1: i32, %arg2: i32, %arg3: memref<16x128xf32, #tpu.memory_space<vmem>>, %arg4: memref<128x128xf32, #tpu.memory_space<vmem>>, %arg5: memref<16x128xf32, #tpu.memory_space<vmem>>, %arg6: memref<16x128xf32, #tpu.memory_space<vmem>>) attributes {dimension_semantics = [#tpu.dimension_semantics<parallel>, #tpu.dimension_semantics<parallel>, #tpu.dimension_semantics<arbitrary>], iteration_bounds = array<i64: 1, 1, 1>, scalar_prefetch = 0 : i64, scratch_operands = 1 : i64, tpu.core_type = #tpu.core_type<tc>, window_params = [{transform_indices = @transform_0, window_bounds = array<i64: 16, 128>}, {transform_indices = @transform_1, window_bounds = array<i64: 128, 128>}, {transform_indices = @transform_2, window_bounds = array<i64: 16, 128>}]} {
    %c0_i32 = arith.constant 0 : i32
    %0 = arith.cmpi eq, %arg2, %c0_i32 : i32
    %1 = arith.extui %0 : i1 to i32
    %c0_i32_0 = arith.constant 0 : i32
    %2 = arith.cmpi ne, %1, %c0_i32_0 : i32
    scf.if %2 {
      %cst_10 = arith.constant 0.000000e+00 : f32
      %12 = vector.broadcast %cst_10 : f32 to vector<16x128xf32>
      %c0_11 = arith.constant 0 : index
      %c0_12 = arith.constant 0 : index
      %13 = vector.load %arg6[%c0_11, %c0_12] : memref<16x128xf32, #tpu.memory_space<vmem>>, vector<16x128xf32>
      tpu.vector_store %arg6[%c0_11, %c0_12], %12 {strides = array<i32>} : memref<16x128xf32, #tpu.memory_space<vmem>>, vector<16x128xf32>,
    } else {
    }
    %c0 = arith.constant 0 : index
    %c0_1 = arith.constant 0 : index
    %3 = vector.load %arg6[%c0, %c0_1] : memref<16x128xf32, #tpu.memory_space<vmem>>, vector<16x128xf32>
    %c0_2 = arith.constant 0 : index
    %c0_3 = arith.constant 0 : index
    %4 = vector.load %arg3[%c0_2, %c0_3] : memref<16x128xf32, #tpu.memory_space<vmem>>, vector<16x128xf32>
    %c0_4 = arith.constant 0 : index
    %c0_5 = arith.constant 0 : index
    %5 = vector.load %arg4[%c0_4, %c0_5] : memref<128x128xf32, #tpu.memory_space<vmem>>, vector<128x128xf32>
    %cst = arith.constant dense<0.000000e+00> : vector<16x128xf32>
    %6 = tpu.matmul %4, %5, %cst {dimension_numbers = #tpu.dot_dimension_numbers<[1], [1], [0], [0], [0, 0, 1, 0], [], []>} : vector<16x128xf32>, vector<128x128xf32>, vector<16x128xf32> -> vector<16x128xf32>
    %7 = arith.addf %3, %6 : vector<16x128xf32>
    %c0_6 = arith.constant 0 : index
    %c0_7 = arith.constant 0 : index
    %8 = vector.load %arg6[%c0_6, %c0_7] : memref<16x128xf32, #tpu.memory_space<vmem>>, vector<16x128xf32>
    tpu.vector_store %arg6[%c0_6, %c0_7], %7 {strides = array<i32>} : memref<16x128xf32, #tpu.memory_space<vmem>>, vector<16x128xf32>,
    %c0_i32_8 = arith.constant 0 : i32
    %9 = arith.cmpi eq, %arg2, %c0_i32_8 : i32
    %10 = arith.extui %9 : i1 to i32
    %c0_i32_9 = arith.constant 0 : i32
    %11 = arith.cmpi ne, %10, %c0_i32_9 : i32
    scf.if %11 {
      %c0_10 = arith.constant 0 : index
      %c0_11 = arith.constant 0 : index
      %12 = vector.load %arg6[%c0_10, %c0_11] : memref<16x128xf32, #tpu.memory_space<vmem>>, vector<16x128xf32>
      %c0_12 = arith.constant 0 : index
      %c0_13 = arith.constant 0 : index
      %13 = vector.load %arg5[%c0_12, %c0_13] : memref<16x128xf32, #tpu.memory_space<vmem>>, vector<16x128xf32>
      tpu.vector_store %arg5[%c0_12, %c0_13], %12 {strides = array<i32>} : memref<16x128xf32, #tpu.memory_space<vmem>>, vector<16x128xf32>,
    } else {
    }
    return
  }
  func.func @transform_0(%arg0: i32, %arg1: i32, %arg2: i32) -> (i32, i32) {
    %c0_i32 = arith.constant 0 : i32
    return %arg0, %arg2 : i32, i32
  }
  func.func @transform_1(%arg0: i32, %arg1: i32, %arg2: i32) -> (i32, i32) {
    %c0_i32 = arith.constant 0 : i32
    return %arg1, %arg2 : i32, i32
  }
  func.func @transform_2(%arg0: i32, %arg1: i32, %arg2: i32) -> (i32, i32) {
    %c0_i32 = arith.constant 0 : i32
    return %arg0, %arg1 : i32, i32
  }
}

</mosaic_0001>

<bundles_post_ra>
// kernel: tpu_custom_call.1
= control target key start
LH: loop header
LB: loop body
LE: loop exit
PB: predicated region body
PF: predicated region fallthrough
CT: control target
= control target key end

     0   :  { %7 = vsyncpa [#allocation4], 0  ;;  %s397_s0 = inlined_call_operand.hbm [shape: f32[16,128], index: 0, kind: input, shape index: {}]   ;;  %s398_s1 = inlined_call_operand.hbm [shape: f32[128,128], index: 1, kind: input, shape index: {}]   ;;  %s399_s2 = inlined_call_operand.hbm [shape: f32[16,128], index: 2, kind: output, shape index: {}]  }
   0x1   :  { %8 = vsyncpa [#allocation7], 0 }
   0x2   :  { %9 = vsyncpa [#allocation5], 0  ;;  %s332_s9 = smov [#allocation3]   ;;  %s260_s13 = scalar_lea.hbm %s397_s0, 256 }
   0x3   :  { %s15_s10 = sshll.u32 %s332_s9, 4  ;;  %p261_p0 = scmp.ne.s32.totalorder %s397_s0, %s260_s13  ;;  %s16_s10 = int_to_ptr.vmem [resolvable:$true] %s15_s10 }
   0x4   :  { %p264_p1 = scmp.lt.u32.totalorder %s260_s13, %s397_s0 }
   0x6   :  { %p266_p2 = pnand %p264_p1, %p261_p0 }
   0x8   :  { %269 = shalt.err (!%p266_p2)
}
   0x9   :  { %s270_s18 = scalar_lea.vmem %s16_s10, 256  ;;  %p275_p4 = scmp.lt.s32.totalorder %s16_s10, %s16_s10 }
   0xa   :  { %p271_p3 = scmp.ne.s32.totalorder %s16_s10, %s270_s18  ;;  %p276_p5 = scmp.lt.s32.totalorder %s270_s18, %s270_s18 }
   0xc   :  { %p277_p6 = por %p276_p5, %p275_p4 }
   0xe   :  { %p278_p7 = pnand %p277_p6, %p271_p3 }
  0x10   :  { %281 = shalt.err (!%p278_p7)
}
  0x11   :  { %s333_s19 = smov 128   ;;  %s334_s20 = smov 8  }
  0x12   :  { %21 = dma.hbm_to_vmem [thread:$0]  %s397_s0, 256, %s16_s10, [#allocation4], %s333_s19, %s333_s19, %s334_s20  }
  0x13   :  { %s335_s23 = smov [#allocation6]   ;;  %s282_s27 = scalar_lea.hbm %s398_s1, 2048 }
  0x14   :  { %s27_s24 = sshll.u32 %s335_s23, 4  ;;  %p283_p8 = scmp.ne.s32.totalorder %s398_s1, %s282_s27  ;;  %s28_s24 = int_to_ptr.vmem [resolvable:$true] %s27_s24 }
  0x15   :  { %p286_p9 = scmp.lt.u32.totalorder %s282_s27, %s398_s1 }
  0x17   :  { %p288_p10 = pnand %p286_p9, %p283_p8 }
  0x19   :  { %291 = shalt.err (!%p288_p10)
}
  0x1a   :  { %s292_s4 = scalar_lea.vmem %s28_s24, 2048  ;;  %p297_p12 = scmp.lt.s32.totalorder %s28_s24, %s28_s24 }
  0x1b   :  { %p293_p11 = scmp.ne.s32.totalorder %s28_s24, %s292_s4  ;;  %p298_p13 = scmp.lt.s32.totalorder %s292_s4, %s292_s4 }
  0x1d   :  { %p299_p0 = por %p298_p13, %p297_p12 }
  0x1f   :  { %p300_p1 = pnand %p299_p0, %p293_p11 }
  0x21   :  { %303 = shalt.err (!%p300_p1)
}
  0x22   :  { %33 = dma.hbm_to_vmem [thread:$0]  %s398_s1, 2048, %s28_s24, [#allocation7], %s333_s19, %s333_s19, %s334_s20  }
  0x23   :  { %326 = dma.done.wait [#allocation4], 256  }
  0x24   :  { %327 = vsyncadd [#allocation4], 4294967040 }
  0x25   :  { %328 = dma.done.wait [#allocation7], 2048  }
  0x26   :  { %329 = vsyncadd [#allocation7], 4294965248  ;;  %v50_v0 = vld [vmem:[#allocation6] sm:$0xff]  ;;  %v51_v1 = vld [vmem:[#allocation6 + $0x8] sm:$0xff]  ;;  %s336_s1 = smov [#allocation8]  }
  0x27   :  { %v52_v2 = vld [vmem:[#allocation6 + $0x10] sm:$0xff]  ;;  %v223_v3 = vpack.c.bf16 %v51_v1, %v50_v0  ;;  %v53_v4 = vld [vmem:[#allocation6 + $0x18] sm:$0xff]  ;;  %v54_v7 = vld [vmem:[#allocation6 + $0x20] sm:$0xff]  ;;  %s157_s6 = sshll.u32 %s336_s1, 4  ;;  %s158_s6 = int_to_ptr.vmem [resolvable:$true] %s157_s6 }
  0x28   :  { %v227_v5 = vpack.c.bf16 %v53_v4, %v52_v2  ;;  %v48_v6 = vld [vmem:[#allocation3] sm:$0xff]  ;;  %v55_v8 = vld [vmem:[#allocation6 + $0x28] sm:$0xff]  ;;  %v57_v11 = vld [vmem:[#allocation6 + $0x38] sm:$0xff]  ;;  %s304_s7 = scalar_lea.vmem %s158_s6, 256  ;;  %p309_p3 = scmp.lt.s32.totalorder %s158_s6, %s158_s6 }
  0x29   :  { %224 = vmatprep.subr.bf16.mxu0 %v223_v3  ;;  %220 = vmatprep.mubr.f32.mxu0 %v48_v6  ;;  %v231_v9 = vpack.c.bf16 %v55_v8, %v54_v7  ;;  %v56_v10 = vld [vmem:[#allocation6 + $0x30] sm:$0xff]  ;;  %v58_v13 = vld [vmem:[#allocation6 + $0x40] sm:$0xff]  ;;  %v59_v14 = vld [vmem:[#allocation6 + $0x48] sm:$0xff]  ;;  %p305_p2 = scmp.ne.s32.totalorder %s158_s6, %s304_s7  ;;  %p310_p4 = scmp.lt.s32.totalorder %s304_s7, %s304_s7 }
  0x2a   :  { %226 = vmatpush3.bf16.xpose.msra.mxu0 %v223_v3  ;;  %v235_v12 = vpack.c.bf16 %v57_v11, %v56_v10  ;;  %v239_v15 = vpack.c.bf16 %v59_v14, %v58_v13  ;;  %v60_v16 = vld [vmem:[#allocation6 + $0x50] sm:$0xff]  ;;  %v61_v17 = vld [vmem:[#allocation6 + $0x58] sm:$0xff]  ;;  %v62_v19 = vld [vmem:[#allocation6 + $0x60] sm:$0xff] }
  0x2b   :  { %228 = vmatprep.subr.bf16.mxu0 %v227_v5  ;;  %v243_v18 = vpack.c.bf16 %v61_v17, %v60_v16  ;;  %v63_v20 = vld [vmem:[#allocation6 + $0x68] sm:$0xff]  ;;  %v64_v22 = vld [vmem:[#allocation6 + $0x70] sm:$0xff]  ;;  %v65_v23 = vld [vmem:[#allocation6 + $0x78] sm:$0xff]  ;;  %p311_p5 = por %p310_p4, %p309_p3 }
  0x2c   :  { %v247_v21 = vpack.c.bf16 %v63_v20, %v62_v19  ;;  %v251_v24 = vpack.c.bf16 %v65_v23, %v64_v22  ;;  %v49_v25 = vld [vmem:[#allocation3 + $0x8] sm:$0xff] }
  0x2d   :  { %p312_p6 = pnand %p311_p5, %p305_p2 }
  0x32   :  { %230 = vmatpush3.bf16.xpose.msra.mxu0 %v227_v5 }
  0x33   :  { %232 = vmatprep.subr.bf16.mxu0 %v231_v9 }
  0x3a   :  { %234 = vmatpush3.bf16.xpose.msra.mxu0 %v231_v9 }
  0x3b   :  { %236 = vmatprep.subr.bf16.mxu0 %v235_v12 }
  0x42   :  { %238 = vmatpush3.bf16.xpose.msra.mxu0 %v235_v12 }
  0x43   :  { %240 = vmatprep.subr.bf16.mxu0 %v239_v15 }
  0x4a   :  { %242 = vmatpush3.bf16.xpose.msra.mxu0 %v239_v15 }
  0x4b   :  { %244 = vmatprep.subr.bf16.mxu0 %v243_v18 }
  0x52   :  { %246 = vmatpush3.bf16.xpose.msra.mxu0 %v243_v18 }
  0x53   :  { %248 = vmatprep.subr.bf16.mxu0 %v247_v21 }
  0x5a   :  { %250 = vmatpush3.bf16.xpose.msra.mxu0 %v247_v21 }
  0x5b   :  { %252 = vmatprep.subr.bf16.mxu0 %v251_v24 }
  0x62   :  { %254 = vmatpush3.bf16.xpose.msra.mxu0 %v251_v24 }
  0x69   :  { %221 = vmatmul.mubr.f32.vlgmr.msra.gmra.mrb[0].mxu0 %v49_v25 }
 0x13c   :  { %v222_v26 = vpop.f32.mrb[0].mxu0 }
 0x13d   :  { %151 = vst [vmem:[#allocation8 + $0x8] sm:$0xff] %v222_v26  ;;  %v132_v27 = vpop.f32.mrb[1].mxu0 }
 0x13e   :  { %150 = vst [vmem:[#allocation8] sm:$0xff] %v132_v27 }
 0x13f   :  { %315 = shalt.err (!%p312_p6)
}
 0x140   :  { %s316_s10 = scalar_lea.hbm %s399_s2, 256 }
 0x141   :  { %p317_p7 = scmp.ne.s32.totalorder %s399_s2, %s316_s10  ;;  %p320_p8 = scmp.lt.u32.totalorder %s316_s10, %s399_s2 }
 0x143   :  { %p322_p9 = pnand %p320_p8, %p317_p7 }
 0x145   :  { %325 = shalt.err (!%p322_p9)
}
 0x146   :  { %163 = dma.vmem_to_hbm [thread:$0]  %s158_s6, 256, %s399_s2, [#allocation5], %s333_s19, %s333_s19, %s334_s20  }
 0x147   :  { %330 = dma.done.wait [#allocation5], 256  }
 0x148   :  { %331 = vsyncadd [#allocation5], 4294967040 }
 0x149   :  { %167 = vsyncpa [#allocation4], 1 }
 0x14a   :  { %168 = vsyncpa [#allocation7], 1 }
 0x14b   :  { %169 = vsyncpa [#allocation5], 1 }

</bundles_post_ra>
